<compile_context>
chip_gen: v7x
topology: tpu7x:2x2x1
jax: 0.10.0
libtpu: 0.0.40
codegen_flags: <defaults>
</compile_context>

<pallas_src>
import functools

import jax
import jax.numpy as jnp
from jax.experimental import pallas as pl
from jax.experimental.pallas import tpu as pltpu

BN_EPS = 1e-5
LANES = 128


def _round_up(n, m):
    return ((n + m - 1) // m) * m


# ---------------------------------------------------------------------------
# In-kernel helpers
# ---------------------------------------------------------------------------
def _write_partial_stats(stats_ref, vals, *, tb, n_valid, needs_mask):
    """Write this tile's partial [sum; sumsq] of `vals` (tb, F) f32 into the
    per-tile (1, 2, F) stats block.  Padded rows are masked out, but only the
    last tile pays for the mask (and only if the batch is actually padded)."""
    i = pl.program_id(0)

    def unmasked():
        stats_ref[0, 0:1, :] = jnp.sum(vals, axis=0, keepdims=True)
        stats_ref[0, 1:2, :] = jnp.sum(vals * vals, axis=0, keepdims=True)

    def masked():
        rows = i * tb + jax.lax.broadcasted_iota(jnp.int32, (tb, 1), 0)
        valid = (rows < n_valid).astype(jnp.float32)
        vm = vals * valid
        stats_ref[0, 0:1, :] = jnp.sum(vm, axis=0, keepdims=True)
        stats_ref[0, 1:2, :] = jnp.sum(vm * vals, axis=0, keepdims=True)

    if needs_mask:
        pl.when(i < pl.num_programs(0) - 1)(unmasked)
        pl.when(i == pl.num_programs(0) - 1)(masked)
    else:
        unmasked()


def _layer1(x_ref, w1_ref, b1_ref):
    """h = x @ W1 + b1 in f32 (MXU runs in the weights' dtype)."""
    return jnp.dot(x_ref[...], w1_ref[...],
                   preferred_element_type=jnp.float32) + b1_ref[...]


def _layer2(h, ss1_ref, w2_ref, b2_ref):
    """z = relu(BN1(h)) @ W2 + b2 in f32; the second dot also uses the
    compute dtype of W2 (bf16 on the bf16 path)."""
    hn = jnp.maximum(h * ss1_ref[0:1, :] + ss1_ref[1:2, :], 0.0)
    return jnp.dot(hn.astype(w2_ref.dtype), w2_ref[...],
                   preferred_element_type=jnp.float32) + b2_ref[...]


# ---------------------------------------------------------------------------
# Kernels — recompute path (small in_width): intermediates never hit HBM
# ---------------------------------------------------------------------------
def h_stats_kernel(x_ref, w1_ref, b1_ref, stats_ref, *, tb, n_valid, needs_mask):
    h = _layer1(x_ref, w1_ref, b1_ref)
    _write_partial_stats(stats_ref, h, tb=tb, n_valid=n_valid, needs_mask=needs_mask)


def z_stats_kernel(x_ref, w1_ref, b1_ref, ss1_ref, w2_ref, b2_ref, stats_ref,
                   *, tb, n_valid, needs_mask):
    h = _layer1(x_ref, w1_ref, b1_ref)
    z = _layer2(h, ss1_ref, w2_ref, b2_ref)
    _write_partial_stats(stats_ref, z, tb=tb, n_valid=n_valid, needs_mask=needs_mask)


def out_kernel(x_ref, w1_ref, b1_ref, ss1_ref, w2_ref, b2_ref, ss2_ref, o_ref):
    h = _layer1(x_ref, w1_ref, b1_ref)
    z = _layer2(h, ss1_ref, w2_ref, b2_ref)
    out = z * ss2_ref[0:1, :] + ss2_ref[1:2, :]
    o_ref[...] = out[:, :o_ref.shape[1]]           # narrow (tb, out_w) write


# ---------------------------------------------------------------------------
# Kernels — materialize path (large in_width): bf16 intermediates
# ---------------------------------------------------------------------------
def linear_stats_mat_kernel(x_ref, w1_ref, b1_ref, h_ref, stats_ref,
                            *, tb, n_valid, needs_mask):
    h = _layer1(x_ref, w1_ref, b1_ref)
    h_store = h.astype(h_ref.dtype)
    h_ref[...] = h_store
    # Stats from the rounded values so pass 2 normalizes exactly what it reads.
    _write_partial_stats(stats_ref, h_store.astype(jnp.float32),
                         tb=tb, n_valid=n_valid, needs_mask=needs_mask)


def bn_relu_linear_stats_mat_kernel(h_ref, ss1_ref, w2_ref, b2_ref, z_ref,
                                    stats_ref, *, tb, n_valid, needs_mask):
    h = h_ref[...].astype(jnp.float32)
    z = _layer2(h, ss1_ref, w2_ref, b2_ref)
    z_store = z.astype(z_ref.dtype)
    z_ref[...] = z_store
    _write_partial_stats(stats_ref, z_store.astype(jnp.float32),
                         tb=tb, n_valid=n_valid, needs_mask=needs_mask)


# ---------------------------------------------------------------------------
# Wrapper
# ---------------------------------------------------------------------------
def _fold_bn(stats, gamma_pad, beta_pad, count):
    """Fold raw batch stats + BN affine into a (2, F) [scale; shift] slab.
    Note: single-pass E[x^2]-mean^2 variance in f32 — can lose precision when
    |mean| >> std; fine for typical inputs (PyTorch uses a two-pass variance)."""
    mu = stats[0] / count
    var = jnp.maximum(stats[1] / count - mu * mu, 0.0)   # biased batch variance
    scale = gamma_pad * jax.lax.rsqrt(var + BN_EPS)
    shift = beta_pad - mu * scale
    return jnp.stack([scale, shift], axis=0)


@functools.partial(jax.jit, static_argnames=("block_rows", "compute_dtype",
                                             "intermediate_dtype", "recompute"))
def dense_encoder_forward(x, params, *, block_rows=2048,
                          compute_dtype=jnp.float32,
                          intermediate_dtype=jnp.bfloat16,
                          recompute=None):
    """params: w1 (in,10), b1 (10,), g1 (10,), be1 (10,),
               w2 (10,out), b2 (out,), g2 (out,), be2 (out,).
    Weights are stored transposed (in_features, out_features) so kernels do x @ W."""
    n, in_w = x.shape
    hidden = params["w1"].shape[1]
    out_w = params["w2"].shape[1]
    hp = _round_up(hidden, LANES)        # lane-dense hidden width
    op = _round_up(out_w, LANES)         # lane-dense width after layer 2

    if recompute is None:
        # Re-reading x three times beats round-tripping wide h/z only while
        # x rows are narrow.
        recompute = in_w <= 512

    # ---- VMEM-aware batch tile --------------------------------------------
    itemsize = jnp.dtype(compute_dtype).itemsize
    inter_bytes = 0 if recompute else jnp.dtype(intermediate_dtype).itemsize
    # Per-row streamed bytes (double-buffered tiles) + f32 temps for h/z.
    row_bytes = (2 * in_w * itemsize + 2 * (hp + op) * inter_bytes
                 + 4 * (hp + op) + 4 * out_w)
    resident_bytes = itemsize * (in_w * hp + hp * op) + 16 * (hp + op)
    budget = 24 * 1024 * 1024            # leave headroom under the 32 MiB limit
    tb_cap = max(16, ((budget - resident_bytes) // row_bytes) // 16 * 16)
    # TODO(synk): if in_width is so large that W1 alone exceeds the VMEM
    # budget, add a K-tiling grid axis over in_width with an f32 accumulator.
    tb = min(_round_up(block_rows, 16), _round_up(n, 16), tb_cap)
    n_pad = _round_up(n, tb)
    grid_n = n_pad // tb
    needs_mask = n_pad != n

    cp = pltpu.CompilerParams(dimension_semantics=("parallel",),
                              vmem_limit_bytes=32 * 1024 * 1024)

    xp = x if n_pad == n else jnp.pad(x, ((0, n_pad - n), (0, 0)))
    xp = xp.astype(compute_dtype)

    # Zero-padded, lane-dense parameters (padded features stay exactly zero).
    w1p = jnp.pad(params["w1"], ((0, 0), (0, hp - hidden))).astype(compute_dtype)
    b1p = jnp.pad(params["b1"], (0, hp - hidden)).reshape(1, hp).astype(jnp.float32)
    g1p = jnp.pad(params["g1"], (0, hp - hidden)).astype(jnp.float32)
    be1p = jnp.pad(params["be1"], (0, hp - hidden)).astype(jnp.float32)
    w2p = jnp.pad(params["w2"], ((0, hp - hidden), (0, op - out_w))).astype(compute_dtype)
    b2p = jnp.pad(params["b2"], (0, op - out_w)).reshape(1, op).astype(jnp.float32)
    g2p = jnp.pad(params["g2"], (0, op - out_w)).astype(jnp.float32)
    be2p = jnp.pad(params["be2"], (0, op - out_w)).astype(jnp.float32)

    x_spec = pl.BlockSpec((tb, in_w), lambda i: (i, 0))
    w1_spec = pl.BlockSpec((in_w, hp), lambda i: (0, 0))   # resident
    b1_spec = pl.BlockSpec((1, hp), lambda i: (0, 0))
    ss1_spec = pl.BlockSpec((2, hp), lambda i: (0, 0))
    w2_spec = pl.BlockSpec((hp, op), lambda i: (0, 0))
    b2_spec = pl.BlockSpec((1, op), lambda i: (0, 0))
    ss2_spec = pl.BlockSpec((2, op), lambda i: (0, 0))
    hstats_spec = pl.BlockSpec((1, 2, hp), lambda i: (i, 0, 0))   # per-tile partials
    zstats_spec = pl.BlockSpec((1, 2, op), lambda i: (i, 0, 0))
    kw = dict(tb=tb, n_valid=n, needs_mask=needs_mask)

    if recompute:
        # ---- pass 1: partial stats of h (no h write) -----------------------
        stats1_parts = pl.pallas_call(
            functools.partial(h_stats_kernel, **kw),
            grid=(grid_n,),
            in_specs=[x_spec, w1_spec, b1_spec],
            out_specs=hstats_spec,
            out_shape=jax.ShapeDtypeStruct((grid_n, 2, hp), jnp.float32),
            compiler_params=cp,
        )(xp, w1p, b1p)
        ss1 = _fold_bn(jnp.sum(stats1_parts, axis=0), g1p, be1p, n)

        # ---- pass 2: recompute h, partial stats of z (no z write) ----------
        stats2_parts = pl.pallas_call(
            functools.partial(z_stats_kernel, **kw),
            grid=(grid_n,),
            in_specs=[x_spec, w1_spec, b1_spec, ss1_spec, w2_spec, b2_spec],
            out_specs=zstats_spec,
            out_shape=jax.ShapeDtypeStruct((grid_n, 2, op), jnp.float32),
            compiler_params=cp,
        )(xp, w1p, b1p, ss1, w2p, b2p)
        ss2 = _fold_bn(jnp.sum(stats2_parts, axis=0), g2p, be2p, n)

        # ---- pass 3: recompute everything, narrow (n_pad, out_w) write -----
        out_p = pl.pallas_call(
            out_kernel,
            grid=(grid_n,),
            in_specs=[x_spec, w1_spec, b1_spec, ss1_spec, w2_spec, b2_spec,
                      ss2_spec],
            out_specs=pl.BlockSpec((tb, out_w), lambda i: (i, 0)),
            out_shape=jax.ShapeDtypeStruct((n_pad, out_w), jnp.float32),
            compiler_params=cp,
        )(xp, w1p, b1p, ss1, w2p, b2p, ss2)
        return out_p[:n]

    # ---- materialize path (large in_width): bf16 h / z round trips ---------
    h, stats1_parts = pl.pallas_call(
        functools.partial(linear_stats_mat_kernel, **kw),
        grid=(grid_n,),
        in_specs=[x_spec, w1_spec, b1_spec],
        out_specs=(pl.BlockSpec((tb, hp), lambda i: (i, 0)), hstats_spec),
        out_shape=(jax.ShapeDtypeStruct((n_pad, hp), intermediate_dtype),
                   jax.ShapeDtypeStruct((grid_n, 2, hp), jnp.float32)),
        compiler_params=cp,
    )(xp, w1p, b1p)
    ss1 = _fold_bn(jnp.sum(stats1_parts, axis=0), g1p, be1p, n)

    z, stats2_parts = pl.pallas_call(
        functools.partial(bn_relu_linear_stats_mat_kernel, **kw),
        grid=(grid_n,),
        in_specs=[pl.BlockSpec((tb, hp), lambda i: (i, 0)),
                  ss1_spec, w2_spec, b2_spec],
        out_specs=(pl.BlockSpec((tb, op), lambda i: (i, 0)), zstats_spec),
        out_shape=(jax.ShapeDtypeStruct((n_pad, op), intermediate_dtype),
                   jax.ShapeDtypeStruct((grid_n, 2, op), jnp.float32)),
        compiler_params=cp,
    )(h, ss1, w2p, b2p)
    ss2 = _fold_bn(jnp.sum(stats2_parts, axis=0), g2p, be2p, n)

    # BN2 affine on the narrow slice in plain JAX (no wide third-pass write).
    return (z[:n, :out_w].astype(jnp.float32) * ss2[0, :out_w] + ss2[1, :out_w])


# ---------------------------------------------------------------------------
# Parameters & plain-JAX reference (PyTorch training-mode semantics)
# ---------------------------------------------------------------------------
def init_params(key, in_width, hidden, out_width):
    k1, k2, k3, k4 = jax.random.split(key, 4)
    lim1 = 1.0 / jnp.sqrt(in_width)
    lim2 = 1.0 / jnp.sqrt(hidden)
    return dict(
        w1=jax.random.uniform(k1, (in_width, hidden), jnp.float32, -lim1, lim1),
        b1=jax.random.uniform(k2, (hidden,), jnp.float32, -lim1, lim1),
        g1=jnp.ones((hidden,), jnp.float32),        # BatchNorm1d weight init
        be1=jnp.zeros((hidden,), jnp.float32),      # BatchNorm1d bias init
        w2=jax.random.uniform(k3, (hidden, out_width), jnp.float32, -lim2, lim2),
        b2=jax.random.uniform(k4, (out_width,), jnp.float32, -lim2, lim2),
        g2=jnp.ones((out_width,), jnp.float32),
        be2=jnp.zeros((out_width,), jnp.float32),
    )


def reference_forward(x, p):
    h = x @ p["w1"] + p["b1"]
    mu = h.mean(0, keepdims=True)
    var = ((h - mu) ** 2).mean(0, keepdims=True)
    h = (h - mu) / jnp.sqrt(var + BN_EPS) * p["g1"] + p["be1"]
    h = jnp.maximum(h, 0.0)
    z = h @ p["w2"] + p["b2"]
    mu2 = z.mean(0, keepdims=True)
    var2 = ((z - mu2) ** 2).mean(0, keepdims=True)
    return (z - mu2) / jnp.sqrt(var2 + BN_EPS) * p["g2"] + p["be2"]


if __name__ == "__main__":
    key = jax.random.PRNGKey(0)
    k_param, k_x = jax.random.split(key)

    batch = 64          # BatchNorm1d (training mode) needs batch > 1
    in_width = 16
    hidden = 10         # fixed by the module definition
    out_width = 4

    params = init_params(k_param, in_width, hidden, out_width)
    x = jax.random.normal(k_x, (batch, in_width), jnp.float32)
    ref = reference_forward(x, params)

    # Default (recompute) path, f32, single batch tile.
    out = jax.block_until_ready(dense_encoder_forward(x, params))
    assert out.shape == (batch, out_width)
    assert jnp.allclose(out, ref, atol=1e-3, rtol=1e-3), "f32 mismatch vs reference"

    # Multi-tile path (exercises per-tile partial stats + cross-tile sum, grid=(4,)).
    out_mt = jax.block_until_ready(dense_encoder_forward(x, params, block_rows=16))
    assert jnp.allclose(out_mt, ref, atol=1e-3, rtol=1e-3), "multi-tile mismatch"

    # Ragged batch (exercises batch padding + last-tile row masking of stats).
    x_odd = x[:50]
    ref_odd = reference_forward(x_odd, params)
    out_odd = jax.block_until_ready(dense_encoder_forward(x_odd, params))
    assert jnp.allclose(out_odd, ref_odd, atol=1e-3, rtol=1e-3), "ragged mismatch"

    # bf16 compute path (halves HBM bytes for x, both matmuls on the bf16 MXU).
    out_bf = jax.block_until_ready(
        dense_encoder_forward(x, params, compute_dtype=jnp.bfloat16))
    assert jnp.allclose(out_bf, ref, atol=1e-1, rtol=1e-1), "bf16 mismatch"

    # Materialize path with exact f32 intermediates (as used for large in_width).
    out_mat = jax.block_until_ready(
        dense_encoder_forward(x, params, recompute=False,
                              intermediate_dtype=jnp.float32, block_rows=16))
    assert jnp.allclose(out_mat, ref, atol=1e-3, rtol=1e-3), "materialize mismatch"

    # Materialize path with bf16 intermediates (the recommended large-in_width config).
    out_mat_bf = jax.block_until_ready(
        dense_encoder_forward(x, params, recompute=False, block_rows=16))
    assert jnp.allclose(out_mat_bf, ref, atol=5e-2, rtol=5e-2), "bf16-intermediate mismatch"

    print("KERNEL_OK")
</pallas_src>

<mosaic_0001>
module attributes {stable_mosaic.version = 11 : i64} {
  func.func @out_kernel(%arg0: i32, %arg1: memref<64x16xf32, #tpu.memory_space<vmem>>, %arg2: memref<16x128xf32, #tpu.memory_space<vmem>>, %arg3: memref<1x128xf32, #tpu.memory_space<vmem>>, %arg4: memref<2x128xf32, #tpu.memory_space<vmem>>, %arg5: memref<128x128xf32, #tpu.memory_space<vmem>>, %arg6: memref<1x128xf32, #tpu.memory_space<vmem>>, %arg7: memref<2x128xf32, #tpu.memory_space<vmem>>, %arg8: memref<64x4xf32, #tpu.memory_space<vmem>>) attributes {dimension_semantics = [#tpu.dimension_semantics<parallel>], iteration_bounds = array<i64: 1>, scalar_prefetch = 0 : i64, scratch_operands = 0 : i64, tpu.core_type = #tpu.core_type<tc>, window_params = [{transform_indices = @transform_0, window_bounds = array<i64: 64, 16>}, {pipeline_mode = #tpu.pipeline_mode<synchronous>, transform_indices = @transform_1, window_bounds = array<i64: 16, 128>}, {pipeline_mode = #tpu.pipeline_mode<synchronous>, transform_indices = @transform_2, window_bounds = array<i64: 1, 128>}, {pipeline_mode = #tpu.pipeline_mode<synchronous>, transform_indices = @transform_3, window_bounds = array<i64: 2, 128>}, {pipeline_mode = #tpu.pipeline_mode<synchronous>, transform_indices = @transform_4, window_bounds = array<i64: 128, 128>}, {pipeline_mode = #tpu.pipeline_mode<synchronous>, transform_indices = @transform_5, window_bounds = array<i64: 1, 128>}, {pipeline_mode = #tpu.pipeline_mode<synchronous>, transform_indices = @transform_6, window_bounds = array<i64: 2, 128>}, {transform_indices = @transform_7, window_bounds = array<i64: 64, 4>}]} {
    %c0 = arith.constant 0 : index
    %c0_0 = arith.constant 0 : index
    %0 = vector.load %arg1[%c0, %c0_0] : memref<64x16xf32, #tpu.memory_space<vmem>>, vector<64x16xf32>
    %c0_1 = arith.constant 0 : index
    %c0_2 = arith.constant 0 : index
    %1 = vector.load %arg2[%c0_1, %c0_2] : memref<16x128xf32, #tpu.memory_space<vmem>>, vector<16x128xf32>
    %cst = arith.constant dense<0.000000e+00> : vector<64x128xf32>
    %2 = tpu.matmul %0, %1, %cst {dimension_numbers = #tpu.dot_dimension_numbers<[1], [0], [0], [1], [0, 0, 1, 1], [], []>} : vector<64x16xf32>, vector<16x128xf32>, vector<64x128xf32> -> vector<64x128xf32>
    %c0_3 = arith.constant 0 : index
    %c0_4 = arith.constant 0 : index
    %3 = vector.load %arg3[%c0_3, %c0_4] : memref<1x128xf32, #tpu.memory_space<vmem>>, vector<1x128xf32>
    %4 = vector.broadcast %3 : vector<1x128xf32> to vector<64x128xf32>
    %5 = arith.addf %2, %4 : vector<64x128xf32>
    %c0_5 = arith.constant 0 : index
    %c0_6 = arith.constant 0 : index
    %6 = vector.load %arg4[%c0_5, %c0_6] : memref<2x128xf32, #tpu.memory_space<vmem>>, vector<1x128xf32>
    %7 = vector.broadcast %6 : vector<1x128xf32> to vector<64x128xf32>
    %8 = arith.mulf %5, %7 : vector<64x128xf32>
    %c1 = arith.constant 1 : index
    %c0_7 = arith.constant 0 : index
    %9 = vector.load %arg4[%c1, %c0_7] : memref<2x128xf32, #tpu.memory_space<vmem>>, vector<1x128xf32>
    %10 = vector.broadcast %9 : vector<1x128xf32> to vector<64x128xf32>
    %11 = arith.addf %8, %10 : vector<64x128xf32>
    %cst_8 = arith.constant 0.000000e+00 : f32
    %12 = vector.broadcast %cst_8 : f32 to vector<64x128xf32>
    %13 = arith.maximumf %11, %12 : vector<64x128xf32>
    %c0_9 = arith.constant 0 : index
    %c0_10 = arith.constant 0 : index
    %14 = vector.load %arg5[%c0_9, %c0_10] : memref<128x128xf32, #tpu.memory_space<vmem>>, vector<128x128xf32>
    %cst_11 = arith.constant dense<0.000000e+00> : vector<64x128xf32>
    %15 = tpu.matmul %13, %14, %cst_11 {dimension_numbers = #tpu.dot_dimension_numbers<[1], [0], [0], [1], [0, 0, 1, 1], [], []>} : vector<64x128xf32>, vector<128x128xf32>, vector<64x128xf32> -> vector<64x128xf32>
    %c0_12 = arith.constant 0 : index
    %c0_13 = arith.constant 0 : index
    %16 = vector.load %arg6[%c0_12, %c0_13] : memref<1x128xf32, #tpu.memory_space<vmem>>, vector<1x128xf32>
    %17 = vector.broadcast %16 : vector<1x128xf32> to vector<64x128xf32>
    %18 = arith.addf %15, %17 : vector<64x128xf32>
    %c0_14 = arith.constant 0 : index
    %c0_15 = arith.constant 0 : index
    %19 = vector.load %arg7[%c0_14, %c0_15] : memref<2x128xf32, #tpu.memory_space<vmem>>, vector<1x128xf32>
    %20 = vector.broadcast %19 : vector<1x128xf32> to vector<64x128xf32>
    %21 = arith.mulf %18, %20 : vector<64x128xf32>
    %c1_16 = arith.constant 1 : index
    %c0_17 = arith.constant 0 : index
    %22 = vector.load %arg7[%c1_16, %c0_17] : memref<2x128xf32, #tpu.memory_space<vmem>>, vector<1x128xf32>
    %23 = vector.broadcast %22 : vector<1x128xf32> to vector<64x128xf32>
    %24 = arith.addf %21, %23 : vector<64x128xf32>
    %25 = vector.extract_strided_slice %24 {offsets = [0, 0], sizes = [64, 4], strides = [1, 1]} : vector<64x128xf32> to vector<64x4xf32>
    %c0_18 = arith.constant 0 : index
    %c0_19 = arith.constant 0 : index
    %26 = vector.load %arg8[%c0_18, %c0_19] : memref<64x4xf32, #tpu.memory_space<vmem>>, vector<64x4xf32>
    tpu.vector_store %arg8[%c0_18, %c0_19], %25 {strides = array<i32>} : memref<64x4xf32, #tpu.memory_space<vmem>>, vector<64x4xf32>,
    return
  }
  func.func @transform_0(%arg0: i32) -> (i32, i32) {
    %c0_i32 = arith.constant 0 : i32
    %c0_i32_0 = arith.constant 0 : i32
    return %arg0, %c0_i32 : i32, i32
  }
  func.func @transform_1(%arg0: i32) -> (i32, i32) {
    %c0_i32 = arith.constant 0 : i32
    %c0_i32_0 = arith.constant 0 : i32
    %c0_i32_1 = arith.constant 0 : i32
    return %c0_i32, %c0_i32_0 : i32, i32
  }
  func.func @transform_2(%arg0: i32) -> (i32, i32) {
    %c0_i32 = arith.constant 0 : i32
    %c0_i32_0 = arith.constant 0 : i32
    %c0_i32_1 = arith.constant 0 : i32
    return %c0_i32, %c0_i32_0 : i32, i32
  }
  func.func @transform_3(%arg0: i32) -> (i32, i32) {
    %c0_i32 = arith.constant 0 : i32
    %c0_i32_0 = arith.constant 0 : i32
    %c0_i32_1 = arith.constant 0 : i32
    return %c0_i32, %c0_i32_0 : i32, i32
  }
  func.func @transform_4(%arg0: i32) -> (i32, i32) {
    %c0_i32 = arith.constant 0 : i32
    %c0_i32_0 = arith.constant 0 : i32
    %c0_i32_1 = arith.constant 0 : i32
    return %c0_i32, %c0_i32_0 : i32, i32
  }
  func.func @transform_5(%arg0: i32) -> (i32, i32) {
    %c0_i32 = arith.constant 0 : i32
    %c0_i32_0 = arith.constant 0 : i32
    %c0_i32_1 = arith.constant 0 : i32
    return %c0_i32, %c0_i32_0 : i32, i32
  }
  func.func @transform_6(%arg0: i32) -> (i32, i32) {
    %c0_i32 = arith.constant 0 : i32
    %c0_i32_0 = arith.constant 0 : i32
    %c0_i32_1 = arith.constant 0 : i32
    return %c0_i32, %c0_i32_0 : i32, i32
  }
  func.func @transform_7(%arg0: i32) -> (i32, i32) {
    %c0_i32 = arith.constant 0 : i32
    %c0_i32_0 = arith.constant 0 : i32
    return %arg0, %c0_i32 : i32, i32
  }
}

module attributes {stable_mosaic.version = 11 : i64} {
  func.func @z_stats_kernel(%arg0: i32, %arg1: memref<64x16xf32, #tpu.memory_space<vmem>>, %arg2: memref<16x128xf32, #tpu.memory_space<vmem>>, %arg3: memref<1x128xf32, #tpu.memory_space<vmem>>, %arg4: memref<2x128xf32, #tpu.memory_space<vmem>>, %arg5: memref<128x128xf32, #tpu.memory_space<vmem>>, %arg6: memref<1x128xf32, #tpu.memory_space<vmem>>, %arg7: memref<1x2x128xf32, #tpu.memory_space<vmem>>) attributes {dimension_semantics = [#tpu.dimension_semantics<parallel>], iteration_bounds = array<i64: 1>, scalar_prefetch = 0 : i64, scratch_operands = 0 : i64, tpu.core_type = #tpu.core_type<tc>, window_params = [{transform_indices = @transform_0, window_bounds = array<i64: 64, 16>}, {pipeline_mode = #tpu.pipeline_mode<synchronous>, transform_indices = @transform_1, window_bounds = array<i64: 16, 128>}, {pipeline_mode = #tpu.pipeline_mode<synchronous>, transform_indices = @transform_2, window_bounds = array<i64: 1, 128>}, {pipeline_mode = #tpu.pipeline_mode<synchronous>, transform_indices = @transform_3, window_bounds = array<i64: 2, 128>}, {pipeline_mode = #tpu.pipeline_mode<synchronous>, transform_indices = @transform_4, window_bounds = array<i64: 128, 128>}, {pipeline_mode = #tpu.pipeline_mode<synchronous>, transform_indices = @transform_5, window_bounds = array<i64: 1, 128>}, {transform_indices = @transform_6, window_bounds = array<i64: 1, 2, 128>}]} {
    %c0 = arith.constant 0 : index
    %c0_0 = arith.constant 0 : index
    %0 = vector.load %arg1[%c0, %c0_0] : memref<64x16xf32, #tpu.memory_space<vmem>>, vector<64x16xf32>
    %c0_1 = arith.constant 0 : index
    %c0_2 = arith.constant 0 : index
    %1 = vector.load %arg2[%c0_1, %c0_2] : memref<16x128xf32, #tpu.memory_space<vmem>>, vector<16x128xf32>
    %cst = arith.constant dense<0.000000e+00> : vector<64x128xf32>
    %2 = tpu.matmul %0, %1, %cst {dimension_numbers = #tpu.dot_dimension_numbers<[1], [0], [0], [1], [0, 0, 1, 1], [], []>} : vector<64x16xf32>, vector<16x128xf32>, vector<64x128xf32> -> vector<64x128xf32>
    %c0_3 = arith.constant 0 : index
    %c0_4 = arith.constant 0 : index
    %3 = vector.load %arg3[%c0_3, %c0_4] : memref<1x128xf32, #tpu.memory_space<vmem>>, vector<1x128xf32>
    %4 = vector.broadcast %3 : vector<1x128xf32> to vector<64x128xf32>
    %5 = arith.addf %2, %4 : vector<64x128xf32>
    %c0_5 = arith.constant 0 : index
    %c0_6 = arith.constant 0 : index
    %6 = vector.load %arg4[%c0_5, %c0_6] : memref<2x128xf32, #tpu.memory_space<vmem>>, vector<1x128xf32>
    %7 = vector.broadcast %6 : vector<1x128xf32> to vector<64x128xf32>
    %8 = arith.mulf %5, %7 : vector<64x128xf32>
    %c1 = arith.constant 1 : index
    %c0_7 = arith.constant 0 : index
    %9 = vector.load %arg4[%c1, %c0_7] : memref<2x128xf32, #tpu.memory_space<vmem>>, vector<1x128xf32>
    %10 = vector.broadcast %9 : vector<1x128xf32> to vector<64x128xf32>
    %11 = arith.addf %8, %10 : vector<64x128xf32>
    %cst_8 = arith.constant 0.000000e+00 : f32
    %12 = vector.broadcast %cst_8 : f32 to vector<64x128xf32>
    %13 = arith.maximumf %11, %12 : vector<64x128xf32>
    %c0_9 = arith.constant 0 : index
    %c0_10 = arith.constant 0 : index
    %14 = vector.load %arg5[%c0_9, %c0_10] : memref<128x128xf32, #tpu.memory_space<vmem>>, vector<128x128xf32>
    %cst_11 = arith.constant dense<0.000000e+00> : vector<64x128xf32>
    %15 = tpu.matmul %13, %14, %cst_11 {dimension_numbers = #tpu.dot_dimension_numbers<[1], [0], [0], [1], [0, 0, 1, 1], [], []>} : vector<64x128xf32>, vector<128x128xf32>, vector<64x128xf32> -> vector<64x128xf32>
    %c0_12 = arith.constant 0 : index
    %c0_13 = arith.constant 0 : index
    %16 = vector.load %arg6[%c0_12, %c0_13] : memref<1x128xf32, #tpu.memory_space<vmem>>, vector<1x128xf32>
    %17 = vector.broadcast %16 : vector<1x128xf32> to vector<64x128xf32>
    %18 = arith.addf %15, %17 : vector<64x128xf32>
    %cst_14 = arith.constant dense<0.000000e+00> : vector<128xf32>
    %19 = vector.multi_reduction <add>, %18, %cst_14 [0] : vector<64x128xf32> to vector<128xf32>
    %20 = vector.shape_cast %19 : vector<128xf32> to vector<1x128xf32>
    %c0_15 = arith.constant 0 : index
    %c0_16 = arith.constant 0 : index
    %c0_17 = arith.constant 0 : index
    %21 = vector.load %arg7[%c0_15, %c0_16, %c0_17] : memref<1x2x128xf32, #tpu.memory_space<vmem>>, vector<1x1x128xf32>
    %22 = vector.shape_cast %21 : vector<1x1x128xf32> to vector<1x128xf32>
    %23 = vector.shape_cast %20 : vector<1x128xf32> to vector<1x1x128xf32>
    tpu.vector_store %arg7[%c0_15, %c0_16, %c0_17], %23 {strides = array<i32>} : memref<1x2x128xf32, #tpu.memory_space<vmem>>, vector<1x1x128xf32>,
    %24 = arith.mulf %18, %18 : vector<64x128xf32>
    %cst_18 = arith.constant dense<0.000000e+00> : vector<128xf32>
    %25 = vector.multi_reduction <add>, %24, %cst_18 [0] : vector<64x128xf32> to vector<128xf32>
    %26 = vector.shape_cast %25 : vector<128xf32> to vector<1x128xf32>
    %c0_19 = arith.constant 0 : index
    %c1_20 = arith.constant 1 : index
    %c0_21 = arith.constant 0 : index
    %27 = vector.load %arg7[%c0_19, %c1_20, %c0_21] : memref<1x2x128xf32, #tpu.memory_space<vmem>>, vector<1x1x128xf32>
    %28 = vector.shape_cast %27 : vector<1x1x128xf32> to vector<1x128xf32>
    %29 = vector.shape_cast %26 : vector<1x128xf32> to vector<1x1x128xf32>
    tpu.vector_store %arg7[%c0_19, %c1_20, %c0_21], %29 {strides = array<i32>} : memref<1x2x128xf32, #tpu.memory_space<vmem>>, vector<1x1x128xf32>,
    return
  }
  func.func @transform_0(%arg0: i32) -> (i32, i32) {
    %c0_i32 = arith.constant 0 : i32
    %c0_i32_0 = arith.constant 0 : i32
    return %arg0, %c0_i32 : i32, i32
  }
  func.func @transform_1(%arg0: i32) -> (i32, i32) {
    %c0_i32 = arith.constant 0 : i32
    %c0_i32_0 = arith.constant 0 : i32
    %c0_i32_1 = arith.constant 0 : i32
    return %c0_i32, %c0_i32_0 : i32, i32
  }
  func.func @transform_2(%arg0: i32) -> (i32, i32) {
    %c0_i32 = arith.constant 0 : i32
    %c0_i32_0 = arith.constant 0 : i32
    %c0_i32_1 = arith.constant 0 : i32
    return %c0_i32, %c0_i32_0 : i32, i32
  }
  func.func @transform_3(%arg0: i32) -> (i32, i32) {
    %c0_i32 = arith.constant 0 : i32
    %c0_i32_0 = arith.constant 0 : i32
    %c0_i32_1 = arith.constant 0 : i32
    return %c0_i32, %c0_i32_0 : i32, i32
  }
  func.func @transform_4(%arg0: i32) -> (i32, i32) {
    %c0_i32 = arith.constant 0 : i32
    %c0_i32_0 = arith.constant 0 : i32
    %c0_i32_1 = arith.constant 0 : i32
    return %c0_i32, %c0_i32_0 : i32, i32
  }
  func.func @transform_5(%arg0: i32) -> (i32, i32) {
    %c0_i32 = arith.constant 0 : i32
    %c0_i32_0 = arith.constant 0 : i32
    %c0_i32_1 = arith.constant 0 : i32
    return %c0_i32, %c0_i32_0 : i32, i32
  }
  func.func @transform_6(%arg0: i32) -> (i32, i32, i32) {
    %c0_i32 = arith.constant 0 : i32
    %c0_i32_0 = arith.constant 0 : i32
    %c0_i32_1 = arith.constant 0 : i32
    return %arg0, %c0_i32, %c0_i32_0 : i32, i32, i32
  }
}

module attributes {stable_mosaic.version = 11 : i64} {
  func.func @h_stats_kernel(%arg0: i32, %arg1: memref<64x16xf32, #tpu.memory_space<vmem>>, %arg2: memref<16x128xf32, #tpu.memory_space<vmem>>, %arg3: memref<1x128xf32, #tpu.memory_space<vmem>>, %arg4: memref<1x2x128xf32, #tpu.memory_space<vmem>>) attributes {dimension_semantics = [#tpu.dimension_semantics<parallel>], iteration_bounds = array<i64: 1>, scalar_prefetch = 0 : i64, scratch_operands = 0 : i64, tpu.core_type = #tpu.core_type<tc>, window_params = [{transform_indices = @transform_0, window_bounds = array<i64: 64, 16>}, {pipeline_mode = #tpu.pipeline_mode<synchronous>, transform_indices = @transform_1, window_bounds = array<i64: 16, 128>}, {pipeline_mode = #tpu.pipeline_mode<synchronous>, transform_indices = @transform_2, window_bounds = array<i64: 1, 128>}, {transform_indices = @transform_3, window_bounds = array<i64: 1, 2, 128>}]} {
    %c0 = arith.constant 0 : index
    %c0_0 = arith.constant 0 : index
    %0 = vector.load %arg1[%c0, %c0_0] : memref<64x16xf32, #tpu.memory_space<vmem>>, vector<64x16xf32>
    %c0_1 = arith.constant 0 : index
    %c0_2 = arith.constant 0 : index
    %1 = vector.load %arg2[%c0_1, %c0_2] : memref<16x128xf32, #tpu.memory_space<vmem>>, vector<16x128xf32>
    %cst = arith.constant dense<0.000000e+00> : vector<64x128xf32>
    %2 = tpu.matmul %0, %1, %cst {dimension_numbers = #tpu.dot_dimension_numbers<[1], [0], [0], [1], [0, 0, 1, 1], [], []>} : vector<64x16xf32>, vector<16x128xf32>, vector<64x128xf32> -> vector<64x128xf32>
    %c0_3 = arith.constant 0 : index
    %c0_4 = arith.constant 0 : index
    %3 = vector.load %arg3[%c0_3, %c0_4] : memref<1x128xf32, #tpu.memory_space<vmem>>, vector<1x128xf32>
    %4 = vector.broadcast %3 : vector<1x128xf32> to vector<64x128xf32>
    %5 = arith.addf %2, %4 : vector<64x128xf32>
    %cst_5 = arith.constant dense<0.000000e+00> : vector<128xf32>
    %6 = vector.multi_reduction <add>, %5, %cst_5 [0] : vector<64x128xf32> to vector<128xf32>
    %7 = vector.shape_cast %6 : vector<128xf32> to vector<1x128xf32>
    %c0_6 = arith.constant 0 : index
    %c0_7 = arith.constant 0 : index
    %c0_8 = arith.constant 0 : index
    %8 = vector.load %arg4[%c0_6, %c0_7, %c0_8] : memref<1x2x128xf32, #tpu.memory_space<vmem>>, vector<1x1x128xf32>
    %9 = vector.shape_cast %8 : vector<1x1x128xf32> to vector<1x128xf32>
    %10 = vector.shape_cast %7 : vector<1x128xf32> to vector<1x1x128xf32>
    tpu.vector_store %arg4[%c0_6, %c0_7, %c0_8], %10 {strides = array<i32>} : memref<1x2x128xf32, #tpu.memory_space<vmem>>, vector<1x1x128xf32>,
    %11 = arith.mulf %5, %5 : vector<64x128xf32>
    %cst_9 = arith.constant dense<0.000000e+00> : vector<128xf32>
    %12 = vector.multi_reduction <add>, %11, %cst_9 [0] : vector<64x128xf32> to vector<128xf32>
    %13 = vector.shape_cast %12 : vector<128xf32> to vector<1x128xf32>
    %c0_10 = arith.constant 0 : index
    %c1 = arith.constant 1 : index
    %c0_11 = arith.constant 0 : index
    %14 = vector.load %arg4[%c0_10, %c1, %c0_11] : memref<1x2x128xf32, #tpu.memory_space<vmem>>, vector<1x1x128xf32>
    %15 = vector.shape_cast %14 : vector<1x1x128xf32> to vector<1x128xf32>
    %16 = vector.shape_cast %13 : vector<1x128xf32> to vector<1x1x128xf32>
    tpu.vector_store %arg4[%c0_10, %c1, %c0_11], %16 {strides = array<i32>} : memref<1x2x128xf32, #tpu.memory_space<vmem>>, vector<1x1x128xf32>,
    return
  }
  func.func @transform_0(%arg0: i32) -> (i32, i32) {
    %c0_i32 = arith.constant 0 : i32
    %c0_i32_0 = arith.constant 0 : i32
    return %arg0, %c0_i32 : i32, i32
  }
  func.func @transform_1(%arg0: i32) -> (i32, i32) {
    %c0_i32 = arith.constant 0 : i32
    %c0_i32_0 = arith.constant 0 : i32
    %c0_i32_1 = arith.constant 0 : i32
    return %c0_i32, %c0_i32_0 : i32, i32
  }
  func.func @transform_2(%arg0: i32) -> (i32, i32) {
    %c0_i32 = arith.constant 0 : i32
    %c0_i32_0 = arith.constant 0 : i32
    %c0_i32_1 = arith.constant 0 : i32
    return %c0_i32, %c0_i32_0 : i32, i32
  }
  func.func @transform_3(%arg0: i32) -> (i32, i32, i32) {
    %c0_i32 = arith.constant 0 : i32
    %c0_i32_0 = arith.constant 0 : i32
    %c0_i32_1 = arith.constant 0 : i32
    return %arg0, %c0_i32, %c0_i32_0 : i32, i32, i32
  }
}

</mosaic_0001>

<bundles_post_ra>
// kernel: dense_encoder_forward.3
= control target key start
LH: loop header
LB: loop body
LE: loop exit
PB: predicated region body
PF: predicated region fallthrough
CT: control target
= control target key end

     0   :  { %vm31_vm0 = vcmask 130048   ;;  %s309_s1 = inlined_call_operand.vmem [shape: f32[16,128], index: 1, kind: input, shape index: {}]   ;;  %s310_s0 = inlined_call_operand.vmem [shape: f32[64,16], index: 0, kind: input, shape index: {}]   ;;  %s311_s2 = inlined_call_operand.vmem [shape: f32[1,128], index: 2, kind: input, shape index: {}]   ;;  %s312_s3 = inlined_call_operand.vmem [shape: f32[1,2,128], index: 3, kind: output, shape index: {}]  }
   0x1   :  { %v22_v0 = vld [vmem:[%s309_s1] sm:$0xff]  ;;  %v23_v1 = vld [vmem:[%s309_s1 + $0x8] sm:$0xff]  ;;  %v16_v7 = vld [vmem:[%s310_s0 + $0x10] sm:$0xff] }
   0x2   :  { %v14_v2 = vld [vmem:[%s310_s0] sm:$0xff]  ;;  %v236_v3 = vpack.c.bf16 %v23_v1, %v22_v0  ;;  %v15_v5 = vld [vmem:[%s310_s0 + $0x8] sm:$0xff]  ;;  %v20_v8 = vld [vmem:[%s310_s0 + $0x30] sm:$0xff] }
   0x3   :  { %224 = vmatprep.mubr.msk.f32.mxu0 %vm31_vm0, %v14_v2  ;;  %v18_v4 = vld [vmem:[%s310_s0 + $0x20] sm:$0xff]  ;;  %v19_v6 = vld [vmem:[%s310_s0 + $0x28] sm:$0xff]  ;;  %v17_v9 = vld [vmem:[%s310_s0 + $0x18] sm:$0xff] }
   0x4   :  { %237 = vmatprep.subr.bf16.mxu0 %v236_v3  ;;  %240 = vmatprep.subr.bf16.mxu1 %v236_v3  ;;  %v21_v10 = vld [vmem:[%s310_s0 + $0x38] sm:$0xff]  ;;  %v201_v11 = vld [vmem:[%s311_s2] ss:$0 sm:$0xff] }
   0x5   :  { %239 = vmatpush3.bf16.msra.mxu0 %v236_v3  ;;  %241 = vmatpush3.bf16.msra.mxu1 %v236_v3 }
   0x6   :  { %230 = vmatprep.mubr.msk.f32.mxu1 %vm31_vm0, %v18_v4 }
   0x8   :  { %225 = vmatmul.mubr.msk.f32.vlgmr.msra.gmra.mrb[0].mxu0 %vm31_vm0, %v15_v5  ;;  %231 = vmatmul.mubr.msk.f32.vlgmr.msra.gmra.mrb[0].mxu1 %vm31_vm0, %v19_v6 }
   0x9   :  { %227 = vmatprep.mubr.msk.f32.mxu0 %vm31_vm0, %v16_v7  ;;  %233 = vmatprep.mubr.msk.f32.mxu1 %vm31_vm0, %v20_v8 }
   0xc   :  { %228 = vmatmul.mubr.msk.f32.gmra.mrb[2].mxu0 %vm31_vm0, %v17_v9  ;;  %234 = vmatmul.mubr.msk.f32.gmra.mrb[2].mxu1 %vm31_vm0, %v21_v10 }
  0xdb   :  { %v226_v12 = vpop.f32.mrb[0].mxu0  ;;  %v232_v13 = vpop.f32.mrb[0].mxu1 }
  0xdc   :  { %v128_v14 = vadd.f32 %v226_v12, %v201_v11  ;;  %v122_v15 = vpop.f32.mrb[1].mxu0  ;;  %v142_v16 = vpop.f32.mrb[1].mxu1  ;;  %v148_v31 = vadd.f32 %v232_v13, %v201_v11 }
  0xdd   :  { %v123_v17 = vadd.f32 %v201_v11, %v122_v15  ;;  %v143_v24 = vadd.f32 %v201_v11, %v142_v16 }
  0xde   :  { %v176_v18 = vmul.f32 %v128_v14, %v128_v14  ;;  %v180_v39 = vmul.f32 %v148_v31, %v148_v31 }
  0xdf   :  { %v161_v19 = vadd.f32 %v128_v14, %v123_v17  ;;  %v175_v20 = vmul.f32 %v123_v17, %v123_v17  ;;  %v229_v21 = vpop.f32.mrb[2].mxu0  ;;  %v235_v22 = vpop.f32.mrb[2].mxu1  ;;  %v179_v32 = vmul.f32 %v143_v24, %v143_v24 }
  0xe0   :  { %v132_v23 = vpop.f32.mrb[3].mxu0  ;;  %v152_v25 = vpop.f32.mrb[3].mxu1  ;;  %v138_v27 = vadd.f32 %v229_v21, %v201_v11  ;;  %v158_v41 = vadd.f32 %v235_v22, %v201_v11 }
  0xe1   :  { %v183_v26 = vadd.f32 %v176_v18, %v175_v20  ;;  %v133_v28 = vadd.f32 %v201_v11, %v132_v23  ;;  %v153_v36 = vadd.f32 %v201_v11, %v152_v25 }
  0xe2   :  { %v178_v33 = vmul.f32 %v138_v27, %v138_v27  ;;  %v182_v46 = vmul.f32 %v158_v41, %v158_v41 }
  0xe3   :  { %v162_v29 = vadd.f32 %v161_v19, %v133_v28  ;;  %v177_v30 = vmul.f32 %v133_v28, %v133_v28  ;;  %v181_v43 = vmul.f32 %v153_v36, %v153_v36 }
  0xe5   :  { %v184_v34 = vadd.f32 %v183_v26, %v177_v30  ;;  %v163_v35 = vadd.f32 %v162_v29, %v138_v27 }
  0xe7   :  { %v164_v37 = vadd.f32 %v163_v35, %v143_v24  ;;  %v185_v38 = vadd.f32 %v184_v34, %v178_v33 }
  0xe9   :  { %v186_v40 = vadd.f32 %v185_v38, %v179_v32  ;;  %v165_v42 = vadd.f32 %v164_v37, %v148_v31 }
  0xeb   :  { %v166_v44 = vadd.f32 %v165_v42, %v153_v36  ;;  %v187_v45 = vadd.f32 %v186_v40, %v180_v39 }
  0xed   :  { %v167_v47 = vadd.f32 %v166_v44, %v158_v41  ;;  %v188_v48 = vadd.f32 %v187_v45, %v181_v43 }
  0xef   :  { %v168_v49 = vrot.slane %v167_v47, 4  ;;  %v189_v50 = vadd.f32 %v188_v48, %v182_v46 }
  0xf1   :  { %v169_v51 = vadd.f32 %v168_v49, %v167_v47  ;;  %v190_v52 = vrot.slane %v189_v50, 4 }
  0xf3   :  { %v170_v53 = vrot.slane %v169_v51, 2  ;;  %v191_v54 = vadd.f32 %v190_v52, %v189_v50 }
  0xf5   :  { %v171_v55 = vadd.f32 %v170_v53, %v169_v51  ;;  %v192_v56 = vrot.slane %v191_v54, 2 }
  0xf7   :  { %v172_v57 = vrot.slane %v171_v55, 1  ;;  %v193_v58 = vadd.f32 %v192_v56, %v191_v54 }
  0xf9   :  { %v173_v59 = vadd.f32 %v172_v57, %v171_v55  ;;  %v194_v60 = vrot.slane %v193_v58, 1 }
  0xfb   :  { %174 = vst [vmem:[%s312_s3] sm:$0x1] %v173_v59  ;;  %v195_v61 = vadd.f32 %v194_v60, %v193_v58 }
  0xfd   :  { %196 = vst [vmem:[%s312_s3 + $0x1] sm:$0x1] %v195_v61 }

// kernel: dense_encoder_forward.4
= control target key start
LH: loop header
LB: loop body
LE: loop exit
PB: predicated region body
PF: predicated region fallthrough
CT: control target
= control target key end

     0   :  { %vm40_vm0 = vcmask 130048   ;;  %s669_s1 = inlined_call_operand.vmem [shape: f32[16,128], index: 1, kind: input, shape index: {}]   ;;  %s670_s0 = inlined_call_operand.vmem [shape: f32[64,16], index: 0, kind: input, shape index: {}]   ;;  %s671_s4 = inlined_call_operand.vmem [shape: f32[128,128], index: 4, kind: input, shape index: {}]   ;;  %s672_s2 = inlined_call_operand.vmem [shape: f32[1,128], index: 2, kind: input, shape index: {}]   ;;  %s673_s3 = inlined_call_operand.vmem [shape: f32[2,128], index: 3, kind: input, shape index: {}]   ;;  %s674_s5 = inlined_call_operand.vmem [shape: f32[1,128], index: 5, kind: input, shape index: {}]   ;;  %s675_s6 = inlined_call_operand.vmem [shape: f32[1,2,128], index: 6, kind: output, shape index: {}]  }
   0x1   :  { %v31_v0 = vld [vmem:[%s669_s1] sm:$0xff]  ;;  %v32_v1 = vld [vmem:[%s669_s1 + $0x8] sm:$0xff]  ;;  %v206_v8 = vld [vmem:[%s671_s4 + $0x10] sm:$0xff] }
   0x2   :  { %v23_v2 = vld [vmem:[%s670_s0] sm:$0xff]  ;;  %v478_v3 = vpack.c.bf16 %v32_v1, %v31_v0  ;;  %v205_v5 = vld [vmem:[%s671_s4 + $0x8] sm:$0xff]  ;;  %v207_v9 = vld [vmem:[%s671_s4 + $0x18] sm:$0xff] }
   0x3   :  { %422 = vmatprep.mubr.msk.f32.mxu0 %vm40_vm0, %v23_v2  ;;  %v204_v4 = vld [vmem:[%s671_s4] sm:$0xff]  ;;  %v24_v6 = vld [vmem:[%s670_s0 + $0x8] sm:$0xff]  ;;  %v25_v10 = vld [vmem:[%s670_s0 + $0x10] sm:$0xff]  ;;  %v486_v11 = vpack.c.bf16 %v207_v9, %v206_v8 }
   0x4   :  { %479 = vmatprep.subr.bf16.mxu0 %v478_v3  ;;  %v482_v7 = vpack.c.bf16 %v205_v5, %v204_v4  ;;  %v208_v12 = vld [vmem:[%s671_s4 + $0x20] sm:$0xff]  ;;  %v209_v13 = vld [vmem:[%s671_s4 + $0x28] sm:$0xff]  ;;  %v26_v14 = vld [vmem:[%s670_s0 + $0x18] sm:$0xff] }
   0x5   :  { %481 = vmatpush3.bf16.msra.mxu0 %v478_v3  ;;  %v27_v15 = vld [vmem:[%s670_s0 + $0x20] sm:$0xff]  ;;  %v490_v16 = vpack.c.bf16 %v209_v13, %v208_v12  ;;  %v210_v17 = vld [vmem:[%s671_s4 + $0x30] sm:$0xff]  ;;  %v211_v18 = vld [vmem:[%s671_s4 + $0x38] sm:$0xff] }
   0x6   :  { %483 = vmatprep.subr.bf16.mxu0 %v482_v7  ;;  %514 = vmatprep.subr.bf16.mxu1 %v482_v7  ;;  %v28_v19 = vld [vmem:[%s670_s0 + $0x28] sm:$0xff]  ;;  %v29_v20 = vld [vmem:[%s670_s0 + $0x30] sm:$0xff]  ;;  %v494_v21 = vpack.c.bf16 %v211_v18, %v210_v17  ;;  %v212_v22 = vld [vmem:[%s671_s4 + $0x40] sm:$0xff] }
   0x7   :  { %522 = vmatpush3.bf16.msra.mxu1 %v482_v7  ;;  %v213_v23 = vld [vmem:[%s671_s4 + $0x48] sm:$0xff]  ;;  %v30_v24 = vld [vmem:[%s670_s0 + $0x38] sm:$0xff]  ;;  %v214_v26 = vld [vmem:[%s671_s4 + $0x50] sm:$0xff] }
   0x8   :  { %423 = vmatmul.mubr.msk.f32.vlgmr.msra.gmra.mrb[0].mxu0 %vm40_vm0, %v24_v6  ;;  %515 = vmatprep.subr.bf16.mxu1 %v486_v11  ;;  %v498_v25 = vpack.c.bf16 %v213_v23, %v212_v22  ;;  %v215_v27 = vld [vmem:[%s671_s4 + $0x58] sm:$0xff]  ;;  %v216_v29 = vld [vmem:[%s671_s4 + $0x60] sm:$0xff]  ;;  %v217_v30 = vld [vmem:[%s671_s4 + $0x68] sm:$0xff] }
   0x9   :  { %425 = vmatprep.mubr.msk.f32.mxu0 %vm40_vm0, %v25_v10  ;;  %485 = vmatpush3.bf16.msra.mxu0 %v482_v7  ;;  %v502_v28 = vpack.c.bf16 %v215_v27, %v214_v26  ;;  %v506_v31 = vpack.c.bf16 %v217_v30, %v216_v29  ;;  %v218_v32 = vld [vmem:[%s671_s4 + $0x70] sm:$0xff]  ;;  %v219_v33 = vld [vmem:[%s671_s4 + $0x78] sm:$0xff]  ;;  %v372_v35 = vld [vmem:[%s672_s2] ss:$0 sm:$0xff] }
   0xa   :  { %487 = vmatprep.subr.bf16.mxu0 %v486_v11  ;;  %v510_v34 = vpack.c.bf16 %v219_v33, %v218_v32  ;;  %v381_v37 = vld [vmem:[%s673_s3] ss:$0 sm:$0xff]  ;;  %v382_v40 = vld [vmem:[%s673_s3 + $0x1] ss:$0 sm:$0xff] }
   0xb   :  { %523 = vmatpush3.bf16.msra.mxu1 %v486_v11 }
   0xc   :  { %426 = vmatmul.mubr.msk.f32.gmra.mrb[2].mxu0 %vm40_vm0, %v26_v14  ;;  %516 = vmatprep.subr.bf16.mxu1 %v490_v16  ;;  %v383_v14 = vld [vmem:[%s674_s5] ss:$0 sm:$0xff] }
   0xd   :  { %428 = vmatprep.mubr.msk.f32.mxu0 %vm40_vm0, %v27_v15  ;;  %489 = vmatpush3.bf16.msra.mxu0 %v486_v11 }
   0xe   :  { %491 = vmatprep.subr.bf16.mxu0 %v490_v16 }
   0xf   :  { %524 = vmatpush3.bf16.msra.mxu1 %v490_v16 }
  0x10   :  { %429 = vmatmul.mubr.msk.f32.gmra.mrb[4].mxu0 %vm40_vm0, %v28_v19  ;;  %517 = vmatprep.subr.bf16.mxu1 %v494_v21 }
  0x11   :  { %431 = vmatprep.mubr.msk.f32.mxu0 %vm40_vm0, %v29_v20  ;;  %493 = vmatpush3.bf16.msra.mxu0 %v490_v16 }
  0x12   :  { %495 = vmatprep.subr.bf16.mxu0 %v494_v21 }
  0x13   :  { %525 = vmatpush3.bf16.msra.mxu1 %v494_v21 }
  0x14   :  { %432 = vmatmul.mubr.msk.f32.gmra.mrb[6].mxu0 %vm40_vm0, %v30_v24  ;;  %518 = vmatprep.subr.bf16.mxu1 %v498_v25 }
  0x15   :  { %497 = vmatpush3.bf16.msra.mxu0 %v494_v21 }
  0x16   :  { %499 = vmatprep.subr.bf16.mxu0 %v498_v25 }
  0x17   :  { %526 = vmatpush3.bf16.msra.mxu1 %v498_v25 }
  0x18   :  { %519 = vmatprep.subr.bf16.mxu1 %v502_v28 }
  0x19   :  { %501 = vmatpush3.bf16.msra.mxu0 %v498_v25 }
  0x1a   :  { %503 = vmatprep.subr.bf16.mxu0 %v502_v28 }
  0x1b   :  { %527 = vmatpush3.bf16.msra.mxu1 %v502_v28 }
  0x1c   :  { %520 = vmatprep.subr.bf16.mxu1 %v506_v31 }
  0x1d   :  { %505 = vmatpush3.bf16.msra.mxu0 %v502_v28 }
  0x1e   :  { %507 = vmatprep.subr.bf16.mxu0 %v506_v31 }
  0x1f   :  { %528 = vmatpush3.bf16.msra.mxu1 %v506_v31 }
  0x20   :  { %521 = vmatprep.subr.bf16.mxu1 %v510_v34 }
  0x21   :  { %509 = vmatpush3.bf16.msra.mxu0 %v506_v31 }
  0x22   :  { %511 = vmatprep.subr.bf16.mxu0 %v510_v34 }
  0x23   :  { %529 = vmatpush3.bf16.msra.mxu1 %v510_v34 }
  0x25   :  { %513 = vmatpush3.bf16.msra.mxu0 %v510_v34 }
  0xdb   :  { %v424_v36 = vpop.f32.mrb[0].mxu0 }
  0xdc   :  { %v137_v38 = vadd.f32 %v424_v36, %v372_v35  ;;  %v131_v39 = vpop.f32.mrb[1].mxu0 }
  0xdd   :  { %v132_v41 = vadd.f32 %v372_v35, %v131_v39 }
  0xde   :  { %v176_v42 = vmul.f32 %v381_v37, %v137_v38 }
  0xdf   :  { %v175_v43 = vmul.f32 %v381_v37, %v132_v41  ;;  %v427_v44 = vpop.f32.mrb[2].mxu0 }
  0xe0   :  { %v189_v45 = vadd.f32 %v382_v40, %v176_v42  ;;  %v147_v46 = vadd.f32 %v427_v44, %v372_v35  ;;  %v141_v47 = vpop.f32.mrb[3].mxu0 }
  0xe1   :  { %v142_v48 = vadd.f32 %v372_v35, %v141_v47  ;;  %v188_v49 = vadd.f32 %v382_v40, %v175_v43 }
  0xe2   :  { %v178_v50 = vmul.f32 %v381_v37, %v147_v46  ;;  %v197_v54 = vmax.f32 %v189_v45, 0.0 }
  0xe3   :  { %v430_v51 = vpop.f32.mrb[4].mxu0  ;;  %v196_v52 = vmax.f32 %v188_v49, 0.0  ;;  %v177_v53 = vmul.f32 %v381_v37, %v142_v48 }
  0xe4   :  { %v157_v55 = vadd.f32 %v430_v51, %v372_v35  ;;  %v151_v56 = vpop.f32.mrb[5].mxu0  ;;  %v191_v57 = vadd.f32 %v382_v40, %v178_v50 }
  0xe5   :  { %v152_v58 = vadd.f32 %v372_v35, %v151_v56  ;;  %466 = vmatprep.mubr.f32.mxu0 %v196_v52  ;;  %v190_v59 = vadd.f32 %v382_v40, %v177_v53 }
  0xe6   :  { %v180_v60 = vmul.f32 %v381_v37, %v157_v55  ;;  %467 = vmatmul.mubr.f32.vlgmr.msra.gmra.mrb[8].mxu0 %v197_v54  ;;  %v199_v2 = vmax.f32 %v191_v57, 0.0 }
  0xe7   :  { %v179_v61 = vmul.f32 %v381_v37, %v152_v58  ;;  %v433_v62 = vpop.f32.mrb[6].mxu0  ;;  %v198_v63 = vmax.f32 %v190_v59, 0.0 }
  0xe8   :  { %v167_v0 = vadd.f32 %v433_v62, %v372_v35  ;;  %v161_v1 = vpop.f32.mrb[7].mxu0  ;;  %v193_v3 = vadd.f32 %v382_v40, %v180_v60 }
  0xe9   :  { %v162_v4 = vadd.f32 %v372_v35, %v161_v1  ;;  %469 = vmatprep.mubr.f32.mxu1 %v198_v63  ;;  %v192_v5 = vadd.f32 %v382_v40, %v179_v61 }
  0xea   :  { %v182_v6 = vmul.f32 %v381_v37, %v167_v0  ;;  %470 = vmatmul.mubr.f32.vlgmr.msra.gmra.mrb[0].mxu1 %v199_v2  ;;  %v201_v9 = vmax.f32 %v193_v3, 0.0 }
  0xeb   :  { %v181_v7 = vmul.f32 %v381_v37, %v162_v4  ;;  %v200_v8 = vmax.f32 %v192_v5, 0.0 }
  0xec   :  { %v195_v10 = vadd.f32 %v382_v40, %v182_v6 }
  0xed   :  { %472 = vmatprep.mubr.f32.mxu1 %v200_v8  ;;  %v194_v11 = vadd.f32 %v382_v40, %v181_v7 }
  0xee   :  { %473 = vmatmul.mubr.f32.gmra.mrb[2].mxu1 %v201_v9  ;;  %v203_v13 = vmax.f32 %v195_v10, 0.0 }
  0xef   :  { %v202_v12 = vmax.f32 %v194_v11, 0.0 }
  0xf1   :  { %475 = vmatprep.mubr.f32.mxu1 %v202_v12 }
  0xf2   :  { %476 = vmatmul.mubr.f32.gmra.mrb[4].mxu1 %v203_v13 }
 0x1b9   :  { %v468_v15 = vpop.f32.mrb[8].mxu0 }
 0x1ba   :  { %v299_v16 = vadd.f32 %v468_v15, %v383_v14  ;;  %v293_v17 = vpop.f32.mrb[9].mxu0 }
 0x1bb   :  { %v294_v18 = vadd.f32 %v383_v14, %v293_v17 }
 0x1bc   :  { %v347_v19 = vmul.f32 %v299_v16, %v299_v16 }
 0x1bd   :  { %v332_v20 = vadd.f32 %v299_v16, %v294_v18  ;;  %v346_v21 = vmul.f32 %v294_v18, %v294_v18  ;;  %v471_v22 = vpop.f32.mrb[0].mxu1 }
 0x1be   :  { %v303_v23 = vpop.f32.mrb[1].mxu1  ;;  %v309_v25 = vadd.f32 %v471_v22, %v383_v14 }
 0x1bf   :  { %v354_v24 = vadd.f32 %v347_v19, %v346_v21  ;;  %v304_v26 = vadd.f32 %v383_v14, %v303_v23 }
 0x1c0   :  { %v349_v32 = vmul.f32 %v309_v25, %v309_v25 }
 0x1c1   :  { %v333_v27 = vadd.f32 %v332_v20, %v304_v26  ;;  %v348_v28 = vmul.f32 %v304_v26, %v304_v26  ;;  %v474_v29 = vpop.f32.mrb[2].mxu1 }
 0x1c2   :  { %v319_v30 = vadd.f32 %v474_v29, %v383_v14  ;;  %v313_v31 = vpop.f32.mrb[3].mxu1 }
 0x1c3   :  { %v355_v33 = vadd.f32 %v354_v24, %v348_v28  ;;  %v314_v34 = vadd.f32 %v383_v14, %v313_v31  ;;  %v334_v35 = vadd.f32 %v333_v27, %v309_v25 }
 0x1c4   :  { %v351_v40 = vmul.f32 %v319_v30, %v319_v30 }
 0x1c5   :  { %v335_v36 = vadd.f32 %v334_v35, %v314_v34  ;;  %v350_v37 = vmul.f32 %v314_v34, %v314_v34  ;;  %v356_v38 = vadd.f32 %v355_v33, %v349_v32  ;;  %v477_v39 = vpop.f32.mrb[4].mxu1 }
 0x1c6   :  { %v323_v41 = vpop.f32.mrb[5].mxu1  ;;  %v329_v43 = vadd.f32 %v477_v39, %v383_v14 }
 0x1c7   :  { %v357_v42 = vadd.f32 %v356_v38, %v350_v37  ;;  %v324_v44 = vadd.f32 %v383_v14, %v323_v41  ;;  %v336_v45 = vadd.f32 %v335_v36, %v319_v30 }
 0x1c8   :  { %v353_v49 = vmul.f32 %v329_v43, %v329_v43 }
 0x1c9   :  { %v337_v46 = vadd.f32 %v336_v45, %v324_v44  ;;  %v352_v47 = vmul.f32 %v324_v44, %v324_v44  ;;  %v358_v48 = vadd.f32 %v357_v42, %v351_v40 }
 0x1cb   :  { %v338_v50 = vadd.f32 %v337_v46, %v329_v43  ;;  %v359_v51 = vadd.f32 %v358_v48, %v352_v47 }
 0x1cd   :  { %v339_v52 = vrot.slane %v338_v50, 4  ;;  %v360_v53 = vadd.f32 %v359_v51, %v353_v49 }
 0x1cf   :  { %v340_v54 = vadd.f32 %v339_v52, %v338_v50  ;;  %v361_v55 = vrot.slane %v360_v53, 4 }
 0x1d1   :  { %v341_v56 = vrot.slane %v340_v54, 2  ;;  %v362_v57 = vadd.f32 %v361_v55, %v360_v53 }
 0x1d3   :  { %v342_v58 = vadd.f32 %v341_v56, %v340_v54  ;;  %v363_v59 = vrot.slane %v362_v57, 2 }
 0x1d5   :  { %v343_v60 = vrot.slane %v342_v58, 1  ;;  %v364_v61 = vadd.f32 %v363_v59, %v362_v57 }
 0x1d7   :  { %v344_v62 = vadd.f32 %v343_v60, %v342_v58  ;;  %v365_v63 = vrot.slane %v364_v61, 1 }
 0x1d9   :  { %345 = vst [vmem:[%s675_s6] sm:$0x1] %v344_v62  ;;  %v366_v0 = vadd.f32 %v365_v63, %v364_v61 }
 0x1db   :  { %367 = vst [vmem:[%s675_s6 + $0x1] sm:$0x1] %v366_v0 }

// kernel: dense_encoder_forward.5
= control target key start
LH: loop header
LB: loop body
LE: loop exit
PB: predicated region body
PF: predicated region fallthrough
CT: control target
= control target key end

     0   :  { %vm43_vm0 = vcmask 130048   ;;  %vm361_vm1 = vcmask 31744   ;;  %s710_s1 = inlined_call_operand.vmem [shape: f32[16,128], index: 1, kind: input, shape index: {}]   ;;  %s711_s0 = inlined_call_operand.vmem [shape: f32[64,16], index: 0, kind: input, shape index: {}]   ;;  %s712_s4 = inlined_call_operand.vmem [shape: f32[128,128], index: 4, kind: input, shape index: {}]   ;;  %s713_s2 = inlined_call_operand.vmem [shape: f32[1,128], index: 2, kind: input, shape index: {}]   ;;  %s714_s3 = inlined_call_operand.vmem [shape: f32[2,128], index: 3, kind: input, shape index: {}]   ;;  %s715_s5 = inlined_call_operand.vmem [shape: f32[1,128], index: 5, kind: input, shape index: {}]   ;;  %s716_s6 = inlined_call_operand.vmem [shape: f32[2,128], index: 6, kind: input, shape index: {}]   ;;  %s717_s7 = inlined_call_operand.vmem [shape: f32[64,4], index: 7, kind: output, shape index: {}]  }
   0x1   :  { %v34_v0 = vld [vmem:[%s710_s1] sm:$0xff]  ;;  %v35_v1 = vld [vmem:[%s710_s1 + $0x8] sm:$0xff]  ;;  %v209_v8 = vld [vmem:[%s712_s4 + $0x10] sm:$0xff] }
   0x2   :  { %v26_v2 = vld [vmem:[%s711_s0] sm:$0xff]  ;;  %v482_v3 = vpack.c.bf16 %v35_v1, %v34_v0  ;;  %v208_v5 = vld [vmem:[%s712_s4 + $0x8] sm:$0xff]  ;;  %v210_v9 = vld [vmem:[%s712_s4 + $0x18] sm:$0xff] }
   0x3   :  { %426 = vmatprep.mubr.msk.f32.mxu0 %vm43_vm0, %v26_v2  ;;  %v207_v4 = vld [vmem:[%s712_s4] sm:$0xff]  ;;  %v27_v6 = vld [vmem:[%s711_s0 + $0x8] sm:$0xff]  ;;  %v28_v10 = vld [vmem:[%s711_s0 + $0x10] sm:$0xff]  ;;  %v490_v11 = vpack.c.bf16 %v210_v9, %v209_v8 }
   0x4   :  { %483 = vmatprep.subr.bf16.mxu0 %v482_v3  ;;  %v486_v7 = vpack.c.bf16 %v208_v5, %v207_v4  ;;  %v211_v12 = vld [vmem:[%s712_s4 + $0x20] sm:$0xff]  ;;  %v212_v13 = vld [vmem:[%s712_s4 + $0x28] sm:$0xff]  ;;  %v29_v14 = vld [vmem:[%s711_s0 + $0x18] sm:$0xff] }
   0x5   :  { %485 = vmatpush3.bf16.msra.mxu0 %v482_v3  ;;  %v30_v15 = vld [vmem:[%s711_s0 + $0x20] sm:$0xff]  ;;  %v494_v16 = vpack.c.bf16 %v212_v13, %v211_v12  ;;  %v213_v17 = vld [vmem:[%s712_s4 + $0x30] sm:$0xff]  ;;  %v214_v18 = vld [vmem:[%s712_s4 + $0x38] sm:$0xff] }
   0x6   :  { %487 = vmatprep.subr.bf16.mxu0 %v486_v7  ;;  %518 = vmatprep.subr.bf16.mxu1 %v486_v7  ;;  %v31_v19 = vld [vmem:[%s711_s0 + $0x28] sm:$0xff]  ;;  %v32_v20 = vld [vmem:[%s711_s0 + $0x30] sm:$0xff]  ;;  %v498_v21 = vpack.c.bf16 %v214_v18, %v213_v17  ;;  %v215_v22 = vld [vmem:[%s712_s4 + $0x40] sm:$0xff] }
   0x7   :  { %526 = vmatpush3.bf16.msra.mxu1 %v486_v7  ;;  %v216_v23 = vld [vmem:[%s712_s4 + $0x48] sm:$0xff]  ;;  %v33_v24 = vld [vmem:[%s711_s0 + $0x38] sm:$0xff]  ;;  %v217_v26 = vld [vmem:[%s712_s4 + $0x50] sm:$0xff] }
   0x8   :  { %427 = vmatmul.mubr.msk.f32.vlgmr.msra.gmra.mrb[0].mxu0 %vm43_vm0, %v27_v6  ;;  %519 = vmatprep.subr.bf16.mxu1 %v490_v11  ;;  %v502_v25 = vpack.c.bf16 %v216_v23, %v215_v22  ;;  %v218_v27 = vld [vmem:[%s712_s4 + $0x58] sm:$0xff]  ;;  %v219_v29 = vld [vmem:[%s712_s4 + $0x60] sm:$0xff]  ;;  %v220_v30 = vld [vmem:[%s712_s4 + $0x68] sm:$0xff] }
   0x9   :  { %429 = vmatprep.mubr.msk.f32.mxu0 %vm43_vm0, %v28_v10  ;;  %489 = vmatpush3.bf16.msra.mxu0 %v486_v7  ;;  %v506_v28 = vpack.c.bf16 %v218_v27, %v217_v26  ;;  %v510_v31 = vpack.c.bf16 %v220_v30, %v219_v29  ;;  %v221_v32 = vld [vmem:[%s712_s4 + $0x70] sm:$0xff]  ;;  %v222_v33 = vld [vmem:[%s712_s4 + $0x78] sm:$0xff]  ;;  %v374_v35 = vld [vmem:[%s713_s2] ss:$0 sm:$0xff] }
   0xa   :  { %491 = vmatprep.subr.bf16.mxu0 %v490_v11  ;;  %v514_v34 = vpack.c.bf16 %v222_v33, %v221_v32  ;;  %v383_v37 = vld [vmem:[%s714_s3] ss:$0 sm:$0xff]  ;;  %v384_v40 = vld [vmem:[%s714_s3 + $0x1] ss:$0 sm:$0xff] }
   0xb   :  { %527 = vmatpush3.bf16.msra.mxu1 %v490_v11 }
   0xc   :  { %430 = vmatmul.mubr.msk.f32.gmra.mrb[2].mxu0 %vm43_vm0, %v29_v14  ;;  %520 = vmatprep.subr.bf16.mxu1 %v494_v16  ;;  %v385_v14 = vld [vmem:[%s715_s5] ss:$0 sm:$0xff] }
   0xd   :  { %432 = vmatprep.mubr.msk.f32.mxu0 %vm43_vm0, %v30_v15  ;;  %493 = vmatpush3.bf16.msra.mxu0 %v490_v11 }
   0xe   :  { %495 = vmatprep.subr.bf16.mxu0 %v494_v16 }
   0xf   :  { %528 = vmatpush3.bf16.msra.mxu1 %v494_v16 }
  0x10   :  { %433 = vmatmul.mubr.msk.f32.gmra.mrb[4].mxu0 %vm43_vm0, %v31_v19  ;;  %521 = vmatprep.subr.bf16.mxu1 %v498_v21  ;;  %v387_v19 = vld [vmem:[%s716_s6 + $0x1] ss:$0 sm:$0xff] }
  0x11   :  { %435 = vmatprep.mubr.msk.f32.mxu0 %vm43_vm0, %v32_v20  ;;  %497 = vmatpush3.bf16.msra.mxu0 %v494_v16  ;;  %v386_v16 = vld [vmem:[%s716_s6] ss:$0 sm:$0xff] }
  0x12   :  { %499 = vmatprep.subr.bf16.mxu0 %v498_v21 }
  0x13   :  { %529 = vmatpush3.bf16.msra.mxu1 %v498_v21 }
  0x14   :  { %436 = vmatmul.mubr.msk.f32.gmra.mrb[6].mxu0 %vm43_vm0, %v33_v24  ;;  %522 = vmatprep.subr.bf16.mxu1 %v502_v25 }
  0x15   :  { %501 = vmatpush3.bf16.msra.mxu0 %v498_v21 }
  0x16   :  { %503 = vmatprep.subr.bf16.mxu0 %v502_v25 }
  0x17   :  { %530 = vmatpush3.bf16.msra.mxu1 %v502_v25 }
  0x18   :  { %523 = vmatprep.subr.bf16.mxu1 %v506_v28 }
  0x19   :  { %505 = vmatpush3.bf16.msra.mxu0 %v502_v25 }
  0x1a   :  { %507 = vmatprep.subr.bf16.mxu0 %v506_v28 }
  0x1b   :  { %531 = vmatpush3.bf16.msra.mxu1 %v506_v28 }
  0x1c   :  { %524 = vmatprep.subr.bf16.mxu1 %v510_v31 }
  0x1d   :  { %509 = vmatpush3.bf16.msra.mxu0 %v506_v28 }
  0x1e   :  { %511 = vmatprep.subr.bf16.mxu0 %v510_v31 }
  0x1f   :  { %532 = vmatpush3.bf16.msra.mxu1 %v510_v31 }
  0x20   :  { %525 = vmatprep.subr.bf16.mxu1 %v514_v34 }
  0x21   :  { %513 = vmatpush3.bf16.msra.mxu0 %v510_v31 }
  0x22   :  { %515 = vmatprep.subr.bf16.mxu0 %v514_v34 }
  0x23   :  { %533 = vmatpush3.bf16.msra.mxu1 %v514_v34 }
  0x25   :  { %517 = vmatpush3.bf16.msra.mxu0 %v514_v34 }
  0xdb   :  { %v428_v36 = vpop.f32.mrb[0].mxu0 }
  0xdc   :  { %v140_v38 = vadd.f32 %v428_v36, %v374_v35  ;;  %v134_v39 = vpop.f32.mrb[1].mxu0 }
  0xdd   :  { %v135_v41 = vadd.f32 %v374_v35, %v134_v39 }
  0xde   :  { %v179_v42 = vmul.f32 %v383_v37, %v140_v38 }
  0xdf   :  { %v178_v43 = vmul.f32 %v383_v37, %v135_v41  ;;  %v431_v44 = vpop.f32.mrb[2].mxu0 }
  0xe0   :  { %v192_v45 = vadd.f32 %v384_v40, %v179_v42  ;;  %v150_v46 = vadd.f32 %v431_v44, %v374_v35  ;;  %v144_v47 = vpop.f32.mrb[3].mxu0 }
  0xe1   :  { %v145_v48 = vadd.f32 %v374_v35, %v144_v47  ;;  %v191_v49 = vadd.f32 %v384_v40, %v178_v43 }
  0xe2   :  { %v181_v50 = vmul.f32 %v383_v37, %v150_v46  ;;  %v200_v54 = vmax.f32 %v192_v45, 0.0 }
  0xe3   :  { %v434_v51 = vpop.f32.mrb[4].mxu0  ;;  %v199_v52 = vmax.f32 %v191_v49, 0.0  ;;  %v180_v53 = vmul.f32 %v383_v37, %v145_v48 }
  0xe4   :  { %v160_v55 = vadd.f32 %v434_v51, %v374_v35  ;;  %v154_v56 = vpop.f32.mrb[5].mxu0  ;;  %v194_v57 = vadd.f32 %v384_v40, %v181_v50 }
  0xe5   :  { %v155_v58 = vadd.f32 %v374_v35, %v154_v56  ;;  %470 = vmatprep.mubr.f32.mxu0 %v199_v52  ;;  %v193_v59 = vadd.f32 %v384_v40, %v180_v53 }
  0xe6   :  { %v183_v60 = vmul.f32 %v383_v37, %v160_v55  ;;  %471 = vmatmul.mubr.f32.vlgmr.msra.gmra.mrb[8].mxu0 %v200_v54  ;;  %v202_v2 = vmax.f32 %v194_v57, 0.0 }
  0xe7   :  { %v182_v61 = vmul.f32 %v383_v37, %v155_v58  ;;  %v437_v62 = vpop.f32.mrb[6].mxu0  ;;  %v201_v63 = vmax.f32 %v193_v59, 0.0 }
  0xe8   :  { %v170_v0 = vadd.f32 %v437_v62, %v374_v35  ;;  %v164_v1 = vpop.f32.mrb[7].mxu0  ;;  %v196_v3 = vadd.f32 %v384_v40, %v183_v60 }
  0xe9   :  { %v165_v4 = vadd.f32 %v374_v35, %v164_v1  ;;  %473 = vmatprep.mubr.f32.mxu1 %v201_v63  ;;  %v195_v5 = vadd.f32 %v384_v40, %v182_v61 }
  0xea   :  { %v185_v6 = vmul.f32 %v383_v37, %v170_v0  ;;  %474 = vmatmul.mubr.f32.vlgmr.msra.gmra.mrb[0].mxu1 %v202_v2  ;;  %v204_v9 = vmax.f32 %v196_v3, 0.0 }
  0xeb   :  { %v184_v7 = vmul.f32 %v383_v37, %v165_v4  ;;  %v203_v8 = vmax.f32 %v195_v5, 0.0 }
  0xec   :  { %v198_v10 = vadd.f32 %v384_v40, %v185_v6 }
  0xed   :  { %476 = vmatprep.mubr.f32.mxu1 %v203_v8  ;;  %v197_v11 = vadd.f32 %v384_v40, %v184_v7 }
  0xee   :  { %477 = vmatmul.mubr.f32.gmra.mrb[2].mxu1 %v204_v9  ;;  %v206_v13 = vmax.f32 %v198_v10, 0.0 }
  0xef   :  { %v205_v12 = vmax.f32 %v197_v11, 0.0 }
  0xf1   :  { %479 = vmatprep.mubr.f32.mxu1 %v205_v12 }
  0xf2   :  { %480 = vmatmul.mubr.f32.gmra.mrb[4].mxu1 %v206_v13 }
 0x1b9   :  { %v472_v15 = vpop.f32.mrb[8].mxu0 }
 0x1ba   :  { %v302_v17 = vadd.f32 %v472_v15, %v385_v14  ;;  %v296_v18 = vpop.f32.mrb[9].mxu0 }
 0x1bb   :  { %v297_v20 = vadd.f32 %v385_v14, %v296_v18 }
 0x1bc   :  { %v341_v21 = vmul.f32 %v386_v16, %v302_v17 }
 0x1bd   :  { %v340_v22 = vmul.f32 %v386_v16, %v297_v20  ;;  %v475_v23 = vpop.f32.mrb[0].mxu1 }
 0x1be   :  { %v354_v24 = vadd.f32 %v387_v19, %v341_v21  ;;  %v312_v25 = vadd.f32 %v475_v23, %v385_v14  ;;  %v306_v26 = vpop.f32.mrb[1].mxu1 }
 0x1bf   :  { %v353_v27 = vadd.f32 %v387_v19, %v340_v22  ;;  %v307_v28 = vadd.f32 %v385_v14, %v306_v26 }
 0x1c0   :  { %363 = vst.msk [vmem:[%s717_s7 + $0x8] sm:$0xff] %vm361_vm1, %v354_v24  ;;  %v343_v29 = vmul.f32 %v386_v16, %v312_v25 }
 0x1c1   :  { %362 = vst.msk [vmem:[%s717_s7] sm:$0xff] %vm361_vm1, %v353_v27  ;;  %v342_v30 = vmul.f32 %v386_v16, %v307_v28  ;;  %v478_v31 = vpop.f32.mrb[2].mxu1 }
 0x1c2   :  { %v356_v32 = vadd.f32 %v387_v19, %v343_v29  ;;  %v322_v33 = vadd.f32 %v478_v31, %v385_v14  ;;  %v316_v34 = vpop.f32.mrb[3].mxu1 }
 0x1c3   :  { %v355_v35 = vadd.f32 %v387_v19, %v342_v30  ;;  %v317_v36 = vadd.f32 %v385_v14, %v316_v34 }
 0x1c4   :  { %365 = vst.msk [vmem:[%s717_s7 + $0x18] sm:$0xff] %vm361_vm1, %v356_v32  ;;  %v345_v37 = vmul.f32 %v386_v16, %v322_v33 }
 0x1c5   :  { %364 = vst.msk [vmem:[%s717_s7 + $0x10] sm:$0xff] %vm361_vm1, %v355_v35  ;;  %v344_v38 = vmul.f32 %v386_v16, %v317_v36  ;;  %v481_v39 = vpop.f32.mrb[4].mxu1 }
 0x1c6   :  { %v358_v40 = vadd.f32 %v387_v19, %v345_v37  ;;  %v332_v41 = vadd.f32 %v481_v39, %v385_v14  ;;  %v326_v42 = vpop.f32.mrb[5].mxu1 }
 0x1c7   :  { %v357_v43 = vadd.f32 %v387_v19, %v344_v38  ;;  %v327_v44 = vadd.f32 %v385_v14, %v326_v42 }
 0x1c8   :  { %367 = vst.msk [vmem:[%s717_s7 + $0x28] sm:$0xff] %vm361_vm1, %v358_v40  ;;  %v347_v45 = vmul.f32 %v386_v16, %v332_v41 }
 0x1c9   :  { %366 = vst.msk [vmem:[%s717_s7 + $0x20] sm:$0xff] %vm361_vm1, %v357_v43  ;;  %v346_v46 = vmul.f32 %v386_v16, %v327_v44 }
 0x1ca   :  { %v360_v47 = vadd.f32 %v387_v19, %v347_v45 }
 0x1cb   :  { %v359_v48 = vadd.f32 %v387_v19, %v346_v46 }
 0x1cc   :  { %369 = vst.msk [vmem:[%s717_s7 + $0x38] sm:$0xff] %vm361_vm1, %v360_v47 }
 0x1cd   :  { %368 = vst.msk [vmem:[%s717_s7 + $0x30] sm:$0xff] %vm361_vm1, %v359_v48 }

</bundles_post_ra>
